<compile_context>
chip_gen: v7x
topology: tpu7x:2x2x1
jax: 0.10.0
libtpu: 0.0.40
codegen_flags: <defaults>
</compile_context>

<pallas_src>
import jax
import jax.numpy as jnp
from jax.experimental import pallas as pl
from jax.experimental.pallas import tpu as pltpu

Z = 10          # feature size implied by split(x2, 10) feeding linear(in=z)
SEQ_LEN = 10
SPLIT = 10
HAS_BIAS = True


# ----------------------------- Pallas kernel -------------------------------

def _fused_kernel(x_ref, w_ref, b_ref, o_ref):
    # x: (tile_b, 10)   w: (8, 10, 80)   b: (8, 1, 80)   o: (8, tile_b, 80)
    # out[c] = sigmoid(x @ W_comb[c] + b_comb[c])   (the +1.2 is folded into b)
    x = x_ref[...]
    n_chunks = w_ref.shape[0]
    for c in range(n_chunks):                         # static unroll (8 chunks)
        y = jnp.dot(x, w_ref[c], preferred_element_type=jnp.float32) + b_ref[c]
        s = pl.reciprocal(1.0 + jnp.exp(-y), approx=True)   # sigmoid on the EUP
        o_ref[c, :, :] = s.astype(o_ref.dtype)


# ------------------------------ parameters ---------------------------------

def init_params(key, z=Z, seq_len=SEQ_LEN, has_bias=HAS_BIAS):
    """Per-layer weights exactly as the torch module defines them."""
    keys = jax.random.split(key, 4 * seq_len)
    w1 = [jax.random.normal(keys[i], (z - i % 5, z), jnp.float32) for i in range(seq_len)]
    w2 = [jax.random.normal(keys[seq_len + i], (z - i % 5, z), jnp.float32) for i in range(seq_len)]
    if has_bias:
        b1 = [jax.random.normal(keys[2 * seq_len + i], (z - i % 5,), jnp.float32) for i in range(seq_len)]
        b2 = [jax.random.normal(keys[3 * seq_len + i], (z - i % 5,), jnp.float32) for i in range(seq_len)]
    else:
        b1 = [jnp.zeros((z - i % 5,), jnp.float32) for i in range(seq_len)]
        b2 = [jnp.zeros((z - i % 5,), jnp.float32) for i in range(seq_len)]
    return w1, b1, w2, b2


def pack_fused_params(w1, b1, w2, b2, split=SPLIT):
    """Fold stage 2 and the +1.2 shift into stage 1.

    Returns W_stack (8, z, 80) and b_stack (8, 1, 80) such that
      out_chunk_c = sigmoid(x @ W_stack[c] + b_stack[c]).
    """
    # torch linear: y = x @ W.T + b -> pack transposed weights along the out dim.
    w1p = jnp.concatenate([w.T for w in w1], axis=1)        # (z, 80)
    w2p = jnp.concatenate([w.T for w in w2], axis=1)        # (z, 80)
    b1p = jnp.concatenate(b1)                                # (80,)
    b2p = jnp.concatenate(b2)                                # (80,)

    n_chunks = w1p.shape[1] // split                         # 8
    w_list, b_list = [], []
    for c in range(n_chunks):
        w1c = w1p[:, c * split:(c + 1) * split]              # (z, 10)
        b1c = b1p[c * split:(c + 1) * split]                 # (10,)
        # ((x+1.2)@W1c + b1c)@W2 + b2 == x@(W1c@W2) + (b1c@W2 + b2 + 1.2*colsum(W1c@W2))
        wc = jnp.matmul(w1c, w2p, precision="highest")                   # (z, 80)
        bc = jnp.matmul(b1c, w2p, precision="highest") + b2p
        bc = bc + 1.2 * jnp.sum(wc, axis=0)                              # fold the +1.2
        w_list.append(wc)
        b_list.append(bc[None, :])
    w_stack = jnp.stack(w_list, axis=0)                      # (8, z, 80)
    b_stack = jnp.stack(b_list, axis=0)                      # (8, 1, 80)
    return w_stack, b_stack


# ------------------------------ module logic --------------------------------

def my_module4_forward(x, w_stack, b_stack, *, tile_b=1024, out_dtype=None):
    """Returns the (8B, 80) output of MyModule4.forward."""
    B, K = x.shape
    n_chunks, _, N = w_stack.shape
    out_dtype = out_dtype or x.dtype      # bf16 here halves HBM writeback if tolerable

    if B <= tile_b:
        # Small / moderate batch: single grid-less call, whole arrays in VMEM.
        out3 = pl.pallas_call(
            _fused_kernel,
            out_shape=jax.ShapeDtypeStruct((n_chunks, B, N), out_dtype),
            in_specs=[pl.BlockSpec(memory_space=pltpu.MemorySpace.VMEM)] * 3,
            out_specs=pl.BlockSpec(memory_space=pltpu.MemorySpace.VMEM),
        )(x, w_stack, b_stack)
    else:
        # Large batch: 1-D batch-tiled grid (pipelined DMA in / compute / writeback),
        # parallel axis so v7x's two TensorCores split the work.
        n_tiles = pl.cdiv(B, tile_b)
        b_pad = n_tiles * tile_b
        x_p = x if b_pad == B else jnp.pad(x, ((0, b_pad - B), (0, 0)))
        out3 = pl.pallas_call(
            _fused_kernel,
            out_shape=jax.ShapeDtypeStruct((n_chunks, b_pad, N), out_dtype),
            grid=(n_tiles,),
            in_specs=[
                pl.BlockSpec((tile_b, K), lambda i: (i, 0)),
                pl.BlockSpec((n_chunks, K, N), lambda i: (0, 0, 0)),
                pl.BlockSpec((n_chunks, 1, N), lambda i: (0, 0, 0)),
            ],
            out_specs=pl.BlockSpec((n_chunks, tile_b, N), lambda i: (0, i, 0)),
            compiler_params=pltpu.CompilerParams(
                dimension_semantics=("parallel",)),
        )(x_p, w_stack, b_stack)
        if b_pad != B:
            out3 = out3[:, :B, :]

    # (8, B, 80) is already the memory order of cat(split(...), dim=0):
    # this reshape is a free contiguous view, not a transpose.
    return out3.reshape(n_chunks * B, N)


# ------------------------------- references ---------------------------------

def reference_forward(x, w1, b1, w2, b2, split=SPLIT):
    """Exact original (torch) semantics in plain JAX."""
    xp = x + 1.2
    x1 = [xp @ w.T + b for w, b in zip(w1, b1)]
    x2 = jnp.concatenate(x1, axis=1)                        # (B, 80)
    x3 = jnp.split(x2, x2.shape[1] // split, axis=1)        # 8 x (B, 10)
    x4 = jnp.concatenate(x3, axis=0)                        # (8B, 10)
    x5 = [x4 @ w.T + b for w, b in zip(w2, b2)]
    x6 = jnp.concatenate(x5, axis=1)                        # (8B, 80)
    return jax.nn.sigmoid(x6)


def reference_fused(x, w_stack, b_stack):
    """Same folded algebra as the kernel, in plain JAX."""
    y = jnp.einsum('bk,ckn->cbn', x, w_stack) + b_stack     # (8, B, 80)
    s = jax.nn.sigmoid(y)
    return s.reshape(-1, s.shape[-1])                       # (8B, 80)


# --------------------------------- driver -----------------------------------

if __name__ == "__main__":
    key = jax.random.PRNGKey(0)
    kx, kp, kx2, kx3 = jax.random.split(key, 4)

    # Small shapes consistent with the module: batch=2, z=10.
    B = 2
    x = jax.random.normal(kx, (B, Z), jnp.float32)

    w1, b1, w2, b2 = init_params(kp)
    w_stack, b_stack = pack_fused_params(w1, b1, w2, b2)
    n_chunks = w_stack.shape[0]

    out = my_module4_forward(x, w_stack, b_stack)
    out = jax.block_until_ready(out)
    assert out.shape == (n_chunks * B, 80), out.shape

    ref_f = reference_fused(x, w_stack, b_stack)
    ref_o = reference_forward(x, w1, b1, w2, b2)
    # Folded algebra + approx-reciprocal sigmoid: tolerance 2e-3 on [0,1] outputs.
    assert jnp.allclose(out, ref_f, atol=2e-3, rtol=2e-3), "mismatch vs fused-algebra reference"
    assert jnp.allclose(out, ref_o, atol=2e-3, rtol=2e-3), "mismatch vs original-semantics reference"

    # Batch-tiled / megacore path (grid > 1, dimension_semantics=("parallel",)).
    B_big = 4096
    x_big = jax.random.normal(kx2, (B_big, Z), jnp.float32)
    out_big = jax.block_until_ready(my_module4_forward(x_big, w_stack, b_stack))
    assert out_big.shape == (n_chunks * B_big, 80), out_big.shape
    assert jnp.allclose(out_big, reference_fused(x_big, w_stack, b_stack),
                        atol=2e-3, rtol=2e-3), "mismatch on batch-tiled path"

    # Ragged batch (not a multiple of tile_b): pad-and-slice path.
    B_rag = 1500
    x_rag = jax.random.normal(kx3, (B_rag, Z), jnp.float32)
    out_rag = jax.block_until_ready(my_module4_forward(x_rag, w_stack, b_stack))
    assert out_rag.shape == (n_chunks * B_rag, 80), out_rag.shape
    assert jnp.allclose(out_rag, reference_fused(x_rag, w_stack, b_stack),
                        atol=2e-3, rtol=2e-3), "mismatch on ragged-batch path"

    print("KERNEL_OK")
</pallas_src>

<mosaic_0001>
module attributes {stable_mosaic.version = 11 : i64} {
  func.func @_fused_kernel(%arg0: memref<2x10xf32, #tpu.memory_space<vmem>>, %arg1: memref<8x10x80xf32, #tpu.memory_space<vmem>>, %arg2: memref<8x1x80xf32, #tpu.memory_space<vmem>>, %arg3: memref<8x2x80xf32, #tpu.memory_space<vmem>>) attributes {dimension_semantics = [], scalar_prefetch = 0 : i64, scratch_operands = 0 : i64, tpu.core_type = #tpu.core_type<tc>} {
    %c0 = arith.constant 0 : index
    %c0_0 = arith.constant 0 : index
    %0 = vector.load %arg0[%c0, %c0_0] : memref<2x10xf32, #tpu.memory_space<vmem>>, vector<2x10xf32>
    %c0_1 = arith.constant 0 : index
    %c0_2 = arith.constant 0 : index
    %c0_3 = arith.constant 0 : index
    %1 = vector.load %arg1[%c0_1, %c0_2, %c0_3] : memref<8x10x80xf32, #tpu.memory_space<vmem>>, vector<1x10x80xf32>
    %2 = vector.shape_cast %1 : vector<1x10x80xf32> to vector<10x80xf32>
    %cst = arith.constant dense<0.000000e+00> : vector<2x80xf32>
    %3 = tpu.matmul %0, %2, %cst {dimension_numbers = #tpu.dot_dimension_numbers<[1], [0], [0], [1], [0, 0, 1, 1], [], []>} : vector<2x10xf32>, vector<10x80xf32>, vector<2x80xf32> -> vector<2x80xf32>
    %c0_4 = arith.constant 0 : index
    %c0_5 = arith.constant 0 : index
    %c0_6 = arith.constant 0 : index
    %4 = vector.load %arg2[%c0_4, %c0_5, %c0_6] : memref<8x1x80xf32, #tpu.memory_space<vmem>>, vector<1x1x80xf32>
    %5 = vector.shape_cast %4 : vector<1x1x80xf32> to vector<1x80xf32>
    %6 = vector.broadcast %5 : vector<1x80xf32> to vector<2x80xf32>
    %7 = arith.addf %3, %6 : vector<2x80xf32>
    %cst_7 = arith.constant 0.000000e+00 : f32
    %8 = vector.broadcast %cst_7 : f32 to vector<2x80xf32>
    %9 = arith.subf %8, %7 : vector<2x80xf32>
    %10 = math.exp %9 : vector<2x80xf32>
    %cst_8 = arith.constant 1.000000e+00 : f32
    %11 = vector.broadcast %cst_8 : f32 to vector<2x80xf32>
    %12 = arith.addf %11, %10 : vector<2x80xf32>
    %13 = tpu.reciprocal %12 {approx = true} : vector<2x80xf32> -> vector<2x80xf32>
    %c0_9 = arith.constant 0 : index
    %c0_10 = arith.constant 0 : index
    %c0_11 = arith.constant 0 : index
    %14 = vector.load %arg3[%c0_9, %c0_10, %c0_11] : memref<8x2x80xf32, #tpu.memory_space<vmem>>, vector<1x2x80xf32>
    %15 = vector.shape_cast %14 : vector<1x2x80xf32> to vector<2x80xf32>
    %16 = vector.shape_cast %13 : vector<2x80xf32> to vector<1x2x80xf32>
    tpu.vector_store %arg3[%c0_9, %c0_10, %c0_11], %16 {strides = array<i32>} : memref<8x2x80xf32, #tpu.memory_space<vmem>>, vector<1x2x80xf32>,
    %c1 = arith.constant 1 : index
    %c0_12 = arith.constant 0 : index
    %c0_13 = arith.constant 0 : index
    %17 = vector.load %arg1[%c1, %c0_12, %c0_13] : memref<8x10x80xf32, #tpu.memory_space<vmem>>, vector<1x10x80xf32>
    %18 = vector.shape_cast %17 : vector<1x10x80xf32> to vector<10x80xf32>
    %cst_14 = arith.constant dense<0.000000e+00> : vector<2x80xf32>
    %19 = tpu.matmul %0, %18, %cst_14 {dimension_numbers = #tpu.dot_dimension_numbers<[1], [0], [0], [1], [0, 0, 1, 1], [], []>} : vector<2x10xf32>, vector<10x80xf32>, vector<2x80xf32> -> vector<2x80xf32>
    %c1_15 = arith.constant 1 : index
    %c0_16 = arith.constant 0 : index
    %c0_17 = arith.constant 0 : index
    %20 = vector.load %arg2[%c1_15, %c0_16, %c0_17] : memref<8x1x80xf32, #tpu.memory_space<vmem>>, vector<1x1x80xf32>
    %21 = vector.shape_cast %20 : vector<1x1x80xf32> to vector<1x80xf32>
    %22 = vector.broadcast %21 : vector<1x80xf32> to vector<2x80xf32>
    %23 = arith.addf %19, %22 : vector<2x80xf32>
    %cst_18 = arith.constant 0.000000e+00 : f32
    %24 = vector.broadcast %cst_18 : f32 to vector<2x80xf32>
    %25 = arith.subf %24, %23 : vector<2x80xf32>
    %26 = math.exp %25 : vector<2x80xf32>
    %cst_19 = arith.constant 1.000000e+00 : f32
    %27 = vector.broadcast %cst_19 : f32 to vector<2x80xf32>
    %28 = arith.addf %27, %26 : vector<2x80xf32>
    %29 = tpu.reciprocal %28 {approx = true} : vector<2x80xf32> -> vector<2x80xf32>
    %c1_20 = arith.constant 1 : index
    %c0_21 = arith.constant 0 : index
    %c0_22 = arith.constant 0 : index
    %30 = vector.load %arg3[%c1_20, %c0_21, %c0_22] : memref<8x2x80xf32, #tpu.memory_space<vmem>>, vector<1x2x80xf32>
    %31 = vector.shape_cast %30 : vector<1x2x80xf32> to vector<2x80xf32>
    %32 = vector.shape_cast %29 : vector<2x80xf32> to vector<1x2x80xf32>
    tpu.vector_store %arg3[%c1_20, %c0_21, %c0_22], %32 {strides = array<i32>} : memref<8x2x80xf32, #tpu.memory_space<vmem>>, vector<1x2x80xf32>,
    %c2 = arith.constant 2 : index
    %c0_23 = arith.constant 0 : index
    %c0_24 = arith.constant 0 : index
    %33 = vector.load %arg1[%c2, %c0_23, %c0_24] : memref<8x10x80xf32, #tpu.memory_space<vmem>>, vector<1x10x80xf32>
    %34 = vector.shape_cast %33 : vector<1x10x80xf32> to vector<10x80xf32>
    %cst_25 = arith.constant dense<0.000000e+00> : vector<2x80xf32>
    %35 = tpu.matmul %0, %34, %cst_25 {dimension_numbers = #tpu.dot_dimension_numbers<[1], [0], [0], [1], [0, 0, 1, 1], [], []>} : vector<2x10xf32>, vector<10x80xf32>, vector<2x80xf32> -> vector<2x80xf32>
    %c2_26 = arith.constant 2 : index
    %c0_27 = arith.constant 0 : index
    %c0_28 = arith.constant 0 : index
    %36 = vector.load %arg2[%c2_26, %c0_27, %c0_28] : memref<8x1x80xf32, #tpu.memory_space<vmem>>, vector<1x1x80xf32>
    %37 = vector.shape_cast %36 : vector<1x1x80xf32> to vector<1x80xf32>
    %38 = vector.broadcast %37 : vector<1x80xf32> to vector<2x80xf32>
    %39 = arith.addf %35, %38 : vector<2x80xf32>
    %cst_29 = arith.constant 0.000000e+00 : f32
    %40 = vector.broadcast %cst_29 : f32 to vector<2x80xf32>
    %41 = arith.subf %40, %39 : vector<2x80xf32>
    %42 = math.exp %41 : vector<2x80xf32>
    %cst_30 = arith.constant 1.000000e+00 : f32
    %43 = vector.broadcast %cst_30 : f32 to vector<2x80xf32>
    %44 = arith.addf %43, %42 : vector<2x80xf32>
    %45 = tpu.reciprocal %44 {approx = true} : vector<2x80xf32> -> vector<2x80xf32>
    %c2_31 = arith.constant 2 : index
    %c0_32 = arith.constant 0 : index
    %c0_33 = arith.constant 0 : index
    %46 = vector.load %arg3[%c2_31, %c0_32, %c0_33] : memref<8x2x80xf32, #tpu.memory_space<vmem>>, vector<1x2x80xf32>
    %47 = vector.shape_cast %46 : vector<1x2x80xf32> to vector<2x80xf32>
    %48 = vector.shape_cast %45 : vector<2x80xf32> to vector<1x2x80xf32>
    tpu.vector_store %arg3[%c2_31, %c0_32, %c0_33], %48 {strides = array<i32>} : memref<8x2x80xf32, #tpu.memory_space<vmem>>, vector<1x2x80xf32>,
    %c3 = arith.constant 3 : index
    %c0_34 = arith.constant 0 : index
    %c0_35 = arith.constant 0 : index
    %49 = vector.load %arg1[%c3, %c0_34, %c0_35] : memref<8x10x80xf32, #tpu.memory_space<vmem>>, vector<1x10x80xf32>
    %50 = vector.shape_cast %49 : vector<1x10x80xf32> to vector<10x80xf32>
    %cst_36 = arith.constant dense<0.000000e+00> : vector<2x80xf32>
    %51 = tpu.matmul %0, %50, %cst_36 {dimension_numbers = #tpu.dot_dimension_numbers<[1], [0], [0], [1], [0, 0, 1, 1], [], []>} : vector<2x10xf32>, vector<10x80xf32>, vector<2x80xf32> -> vector<2x80xf32>
    %c3_37 = arith.constant 3 : index
    %c0_38 = arith.constant 0 : index
    %c0_39 = arith.constant 0 : index
    %52 = vector.load %arg2[%c3_37, %c0_38, %c0_39] : memref<8x1x80xf32, #tpu.memory_space<vmem>>, vector<1x1x80xf32>
    %53 = vector.shape_cast %52 : vector<1x1x80xf32> to vector<1x80xf32>
    %54 = vector.broadcast %53 : vector<1x80xf32> to vector<2x80xf32>
    %55 = arith.addf %51, %54 : vector<2x80xf32>
    %cst_40 = arith.constant 0.000000e+00 : f32
    %56 = vector.broadcast %cst_40 : f32 to vector<2x80xf32>
    %57 = arith.subf %56, %55 : vector<2x80xf32>
    %58 = math.exp %57 : vector<2x80xf32>
    %cst_41 = arith.constant 1.000000e+00 : f32
    %59 = vector.broadcast %cst_41 : f32 to vector<2x80xf32>
    %60 = arith.addf %59, %58 : vector<2x80xf32>
    %61 = tpu.reciprocal %60 {approx = true} : vector<2x80xf32> -> vector<2x80xf32>
    %c3_42 = arith.constant 3 : index
    %c0_43 = arith.constant 0 : index
    %c0_44 = arith.constant 0 : index
    %62 = vector.load %arg3[%c3_42, %c0_43, %c0_44] : memref<8x2x80xf32, #tpu.memory_space<vmem>>, vector<1x2x80xf32>
    %63 = vector.shape_cast %62 : vector<1x2x80xf32> to vector<2x80xf32>
    %64 = vector.shape_cast %61 : vector<2x80xf32> to vector<1x2x80xf32>
    tpu.vector_store %arg3[%c3_42, %c0_43, %c0_44], %64 {strides = array<i32>} : memref<8x2x80xf32, #tpu.memory_space<vmem>>, vector<1x2x80xf32>,
    %c4 = arith.constant 4 : index
    %c0_45 = arith.constant 0 : index
    %c0_46 = arith.constant 0 : index
    %65 = vector.load %arg1[%c4, %c0_45, %c0_46] : memref<8x10x80xf32, #tpu.memory_space<vmem>>, vector<1x10x80xf32>
    %66 = vector.shape_cast %65 : vector<1x10x80xf32> to vector<10x80xf32>
    %cst_47 = arith.constant dense<0.000000e+00> : vector<2x80xf32>
    %67 = tpu.matmul %0, %66, %cst_47 {dimension_numbers = #tpu.dot_dimension_numbers<[1], [0], [0], [1], [0, 0, 1, 1], [], []>} : vector<2x10xf32>, vector<10x80xf32>, vector<2x80xf32> -> vector<2x80xf32>
    %c4_48 = arith.constant 4 : index
    %c0_49 = arith.constant 0 : index
    %c0_50 = arith.constant 0 : index
    %68 = vector.load %arg2[%c4_48, %c0_49, %c0_50] : memref<8x1x80xf32, #tpu.memory_space<vmem>>, vector<1x1x80xf32>
    %69 = vector.shape_cast %68 : vector<1x1x80xf32> to vector<1x80xf32>
    %70 = vector.broadcast %69 : vector<1x80xf32> to vector<2x80xf32>
    %71 = arith.addf %67, %70 : vector<2x80xf32>
    %cst_51 = arith.constant 0.000000e+00 : f32
    %72 = vector.broadcast %cst_51 : f32 to vector<2x80xf32>
    %73 = arith.subf %72, %71 : vector<2x80xf32>
    %74 = math.exp %73 : vector<2x80xf32>
    %cst_52 = arith.constant 1.000000e+00 : f32
    %75 = vector.broadcast %cst_52 : f32 to vector<2x80xf32>
    %76 = arith.addf %75, %74 : vector<2x80xf32>
    %77 = tpu.reciprocal %76 {approx = true} : vector<2x80xf32> -> vector<2x80xf32>
    %c4_53 = arith.constant 4 : index
    %c0_54 = arith.constant 0 : index
    %c0_55 = arith.constant 0 : index
    %78 = vector.load %arg3[%c4_53, %c0_54, %c0_55] : memref<8x2x80xf32, #tpu.memory_space<vmem>>, vector<1x2x80xf32>
    %79 = vector.shape_cast %78 : vector<1x2x80xf32> to vector<2x80xf32>
    %80 = vector.shape_cast %77 : vector<2x80xf32> to vector<1x2x80xf32>
    tpu.vector_store %arg3[%c4_53, %c0_54, %c0_55], %80 {strides = array<i32>} : memref<8x2x80xf32, #tpu.memory_space<vmem>>, vector<1x2x80xf32>,
    %c5 = arith.constant 5 : index
    %c0_56 = arith.constant 0 : index
    %c0_57 = arith.constant 0 : index
    %81 = vector.load %arg1[%c5, %c0_56, %c0_57] : memref<8x10x80xf32, #tpu.memory_space<vmem>>, vector<1x10x80xf32>
    %82 = vector.shape_cast %81 : vector<1x10x80xf32> to vector<10x80xf32>
    %cst_58 = arith.constant dense<0.000000e+00> : vector<2x80xf32>
    %83 = tpu.matmul %0, %82, %cst_58 {dimension_numbers = #tpu.dot_dimension_numbers<[1], [0], [0], [1], [0, 0, 1, 1], [], []>} : vector<2x10xf32>, vector<10x80xf32>, vector<2x80xf32> -> vector<2x80xf32>
    %c5_59 = arith.constant 5 : index
    %c0_60 = arith.constant 0 : index
    %c0_61 = arith.constant 0 : index
    %84 = vector.load %arg2[%c5_59, %c0_60, %c0_61] : memref<8x1x80xf32, #tpu.memory_space<vmem>>, vector<1x1x80xf32>
    %85 = vector.shape_cast %84 : vector<1x1x80xf32> to vector<1x80xf32>
    %86 = vector.broadcast %85 : vector<1x80xf32> to vector<2x80xf32>
    %87 = arith.addf %83, %86 : vector<2x80xf32>
    %cst_62 = arith.constant 0.000000e+00 : f32
    %88 = vector.broadcast %cst_62 : f32 to vector<2x80xf32>
    %89 = arith.subf %88, %87 : vector<2x80xf32>
    %90 = math.exp %89 : vector<2x80xf32>
    %cst_63 = arith.constant 1.000000e+00 : f32
    %91 = vector.broadcast %cst_63 : f32 to vector<2x80xf32>
    %92 = arith.addf %91, %90 : vector<2x80xf32>
    %93 = tpu.reciprocal %92 {approx = true} : vector<2x80xf32> -> vector<2x80xf32>
    %c5_64 = arith.constant 5 : index
    %c0_65 = arith.constant 0 : index
    %c0_66 = arith.constant 0 : index
    %94 = vector.load %arg3[%c5_64, %c0_65, %c0_66] : memref<8x2x80xf32, #tpu.memory_space<vmem>>, vector<1x2x80xf32>
    %95 = vector.shape_cast %94 : vector<1x2x80xf32> to vector<2x80xf32>
    %96 = vector.shape_cast %93 : vector<2x80xf32> to vector<1x2x80xf32>
    tpu.vector_store %arg3[%c5_64, %c0_65, %c0_66], %96 {strides = array<i32>} : memref<8x2x80xf32, #tpu.memory_space<vmem>>, vector<1x2x80xf32>,
    %c6 = arith.constant 6 : index
    %c0_67 = arith.constant 0 : index
    %c0_68 = arith.constant 0 : index
    %97 = vector.load %arg1[%c6, %c0_67, %c0_68] : memref<8x10x80xf32, #tpu.memory_space<vmem>>, vector<1x10x80xf32>
    %98 = vector.shape_cast %97 : vector<1x10x80xf32> to vector<10x80xf32>
    %cst_69 = arith.constant dense<0.000000e+00> : vector<2x80xf32>
    %99 = tpu.matmul %0, %98, %cst_69 {dimension_numbers = #tpu.dot_dimension_numbers<[1], [0], [0], [1], [0, 0, 1, 1], [], []>} : vector<2x10xf32>, vector<10x80xf32>, vector<2x80xf32> -> vector<2x80xf32>
    %c6_70 = arith.constant 6 : index
    %c0_71 = arith.constant 0 : index
    %c0_72 = arith.constant 0 : index
    %100 = vector.load %arg2[%c6_70, %c0_71, %c0_72] : memref<8x1x80xf32, #tpu.memory_space<vmem>>, vector<1x1x80xf32>
    %101 = vector.shape_cast %100 : vector<1x1x80xf32> to vector<1x80xf32>
    %102 = vector.broadcast %101 : vector<1x80xf32> to vector<2x80xf32>
    %103 = arith.addf %99, %102 : vector<2x80xf32>
    %cst_73 = arith.constant 0.000000e+00 : f32
    %104 = vector.broadcast %cst_73 : f32 to vector<2x80xf32>
    %105 = arith.subf %104, %103 : vector<2x80xf32>
    %106 = math.exp %105 : vector<2x80xf32>
    %cst_74 = arith.constant 1.000000e+00 : f32
    %107 = vector.broadcast %cst_74 : f32 to vector<2x80xf32>
    %108 = arith.addf %107, %106 : vector<2x80xf32>
    %109 = tpu.reciprocal %108 {approx = true} : vector<2x80xf32> -> vector<2x80xf32>
    %c6_75 = arith.constant 6 : index
    %c0_76 = arith.constant 0 : index
    %c0_77 = arith.constant 0 : index
    %110 = vector.load %arg3[%c6_75, %c0_76, %c0_77] : memref<8x2x80xf32, #tpu.memory_space<vmem>>, vector<1x2x80xf32>
    %111 = vector.shape_cast %110 : vector<1x2x80xf32> to vector<2x80xf32>
    %112 = vector.shape_cast %109 : vector<2x80xf32> to vector<1x2x80xf32>
    tpu.vector_store %arg3[%c6_75, %c0_76, %c0_77], %112 {strides = array<i32>} : memref<8x2x80xf32, #tpu.memory_space<vmem>>, vector<1x2x80xf32>,
    %c7 = arith.constant 7 : index
    %c0_78 = arith.constant 0 : index
    %c0_79 = arith.constant 0 : index
    %113 = vector.load %arg1[%c7, %c0_78, %c0_79] : memref<8x10x80xf32, #tpu.memory_space<vmem>>, vector<1x10x80xf32>
    %114 = vector.shape_cast %113 : vector<1x10x80xf32> to vector<10x80xf32>
    %cst_80 = arith.constant dense<0.000000e+00> : vector<2x80xf32>
    %115 = tpu.matmul %0, %114, %cst_80 {dimension_numbers = #tpu.dot_dimension_numbers<[1], [0], [0], [1], [0, 0, 1, 1], [], []>} : vector<2x10xf32>, vector<10x80xf32>, vector<2x80xf32> -> vector<2x80xf32>
    %c7_81 = arith.constant 7 : index
    %c0_82 = arith.constant 0 : index
    %c0_83 = arith.constant 0 : index
    %116 = vector.load %arg2[%c7_81, %c0_82, %c0_83] : memref<8x1x80xf32, #tpu.memory_space<vmem>>, vector<1x1x80xf32>
    %117 = vector.shape_cast %116 : vector<1x1x80xf32> to vector<1x80xf32>
    %118 = vector.broadcast %117 : vector<1x80xf32> to vector<2x80xf32>
    %119 = arith.addf %115, %118 : vector<2x80xf32>
    %cst_84 = arith.constant 0.000000e+00 : f32
    %120 = vector.broadcast %cst_84 : f32 to vector<2x80xf32>
    %121 = arith.subf %120, %119 : vector<2x80xf32>
    %122 = math.exp %121 : vector<2x80xf32>
    %cst_85 = arith.constant 1.000000e+00 : f32
    %123 = vector.broadcast %cst_85 : f32 to vector<2x80xf32>
    %124 = arith.addf %123, %122 : vector<2x80xf32>
    %125 = tpu.reciprocal %124 {approx = true} : vector<2x80xf32> -> vector<2x80xf32>
    %c7_86 = arith.constant 7 : index
    %c0_87 = arith.constant 0 : index
    %c0_88 = arith.constant 0 : index
    %126 = vector.load %arg3[%c7_86, %c0_87, %c0_88] : memref<8x2x80xf32, #tpu.memory_space<vmem>>, vector<1x2x80xf32>
    %127 = vector.shape_cast %126 : vector<1x2x80xf32> to vector<2x80xf32>
    %128 = vector.shape_cast %125 : vector<2x80xf32> to vector<1x2x80xf32>
    tpu.vector_store %arg3[%c7_86, %c0_87, %c0_88], %128 {strides = array<i32>} : memref<8x2x80xf32, #tpu.memory_space<vmem>>, vector<1x2x80xf32>,
    return
  }
}

</mosaic_0001>

<bundles_post_ra>
// kernel: tpu_custom_call.1
= control target key start
LH: loop header
LB: loop body
LE: loop exit
PB: predicated region body
PF: predicated region fallthrough
CT: control target
= control target key end

     0   :  { %vm29_vm0 = vcmask 1041408   ;;  %v983_v2 = vmov 0.0|0.0   ;;  %vm984_vm1 = vmmov 1   ;;  %vm985_vm3 = vmmov 0   ;;  %s1141_s0 = inlined_call_operand.vmem [shape: f32[2,10], index: 0, kind: input, shape index: {}]   ;;  %s1142_s1 = inlined_call_operand.vmem [shape: f32[8,10,80], index: 1, kind: input, shape index: {}]   ;;  %s1143_s2 = inlined_call_operand.vmem [shape: f32[8,1,80], index: 2, kind: input, shape index: {}]   ;;  %s1144_s3 = inlined_call_operand.hbm [shape: f32[8,2,80], index: 3, kind: output, shape index: {}]  }
   0x1   :  { %v16_v0 = vld [vmem:[%s1142_s1] sm:$0xff]  ;;  %v17_v1 = vld [vmem:[%s1142_s1 + $0x8] sm:$0x3]  ;;  %888 = vmatprep.subr.bf16.mxu0 %v983_v2  ;;  %892 = vmatprep.subr.bf16.mxu1 %v983_v2  ;;  %vm1016_vm2 = vmpackc.low %vm29_vm0, %vm984_vm1  ;;  %v986_v8 = vmov 0.0   ;;  %vm25_vm4 = vcmask 80896  }
   0x2   :  { %v889_v3 = vpack.c.bf16 %v17_v1, %v16_v0  ;;  %v766_v5 = vld [vmem:[%s1142_s1 + $0x10] sm:$0xff]  ;;  %v767_v6 = vld [vmem:[%s1142_s1 + $0x18] sm:$0x3]  ;;  %836 = vmatprep.mubr.msk.f32.mxu0 %vm985_vm3, %v986_v8  ;;  %843 = vmatprep.mubr.msk.f32.mxu1 %vm985_vm3, %v986_v8  ;;  %v772_v9 = vld [vmem:[%s1142_s1 + $0x20] sm:$0xff] }
   0x3   :  { %v893_v7 = vpack.c.bf16 %v767_v6, %v766_v5  ;;  %v773_v10 = vld [vmem:[%s1142_s1 + $0x28] sm:$0x3]  ;;  %v15_v11 = vld [vmem:[%s1141_s0] sm:$0x3]  ;;  %v778_v13 = vld [vmem:[%s1142_s1 + $0x30] sm:$0xff] }
   0x4   :  { %891 = vmatpush3.bf16.msk.msra.mxu0 %vm1016_vm2, %v889_v3  ;;  %v897_v12 = vpack.c.bf16 %v773_v10, %v772_v9  ;;  %v779_v14 = vld [vmem:[%s1142_s1 + $0x38] sm:$0x3]  ;;  %v784_v16 = vld [vmem:[%s1142_s1 + $0x40] sm:$0xff]  ;;  %v785_v17 = vld [vmem:[%s1142_s1 + $0x48] sm:$0x3] }
   0x5   :  { %895 = vmatpush3.bf16.msk.msra.mxu1 %vm1016_vm2, %v893_v7  ;;  %896 = vmatprep.subr.bf16.mxu0 %v983_v2  ;;  %v901_v15 = vpack.c.bf16 %v779_v14, %v778_v13  ;;  %v790_v18 = vld [vmem:[%s1142_s1 + $0x50] sm:$0xff]  ;;  %v791_v19 = vld [vmem:[%s1142_s1 + $0x58] sm:$0x3] }
   0x6   :  { %900 = vmatprep.subr.bf16.mxu1 %v983_v2 }
   0x7   :  { %837 = vmatmul.mubr.msk.f32.vlgmr.msra.gmra.mrb[0].mxu0 %vm25_vm4, %v15_v11 }
   0x8   :  { %8 = vsyncpa [#allocation3], 0  ;;  %844 = vmatmul.mubr.msk.f32.vlgmr.msra.gmra.mrb[0].mxu1 %vm25_vm4, %v15_v11  ;;  %899 = vmatpush3.bf16.msk.msra.mxu0 %vm1016_vm2, %v897_v12  ;;  %v905_v20 = vpack.c.bf16 %v785_v17, %v784_v16  ;;  %v909_v21 = vpack.c.bf16 %v791_v19, %v790_v18  ;;  %v796_v22 = vld [vmem:[%s1142_s1 + $0x60] sm:$0xff]  ;;  %v797_v23 = vld [vmem:[%s1142_s1 + $0x68] sm:$0x3]  ;;  %vm108_vm5 = vcmask 648192  }
   0x9   :  { %903 = vmatpush3.bf16.msk.msra.mxu1 %vm1016_vm2, %v901_v15  ;;  %850 = vmatprep.mubr.msk.f32.mxu0 %vm985_vm3, %v986_v8  ;;  %v802_v24 = vld [vmem:[%s1142_s1 + $0x70] sm:$0xff]  ;;  %v803_v25 = vld [vmem:[%s1142_s1 + $0x78] sm:$0x3]  ;;  %v913_v26 = vpack.c.bf16 %v797_v23, %v796_v22  ;;  %v763_v28 = vld [vmem:[%s1143_s2] ss:$0 sm:$0xff] }
   0xa   :  { %857 = vmatprep.mubr.msk.f32.mxu1 %vm985_vm3, %v986_v8  ;;  %904 = vmatprep.subr.bf16.mxu0 %v983_v2  ;;  %v917_v27 = vpack.c.bf16 %v803_v25, %v802_v24  ;;  %v769_v29 = vld [vmem:[%s1143_s2 + $0x1] ss:$0 sm:$0xff]  ;;  %v775_v36 = vld [vmem:[%s1143_s2 + $0x2] ss:$0 sm:$0xff]  ;;  %v781_v38 = vld [vmem:[%s1143_s2 + $0x3] ss:$0 sm:$0xff] }
   0xb   :  { %851 = vmatmul.mubr.msk.f32.vlgmr.msra.gmra.mrb[2].mxu0 %vm25_vm4, %v15_v11  ;;  %908 = vmatprep.subr.bf16.mxu1 %v983_v2  ;;  %v787_v48 = vld [vmem:[%s1143_s2 + $0x4] ss:$0 sm:$0xff]  ;;  %v793_v50 = vld [vmem:[%s1143_s2 + $0x5] ss:$0 sm:$0xff]  ;;  %v799_v60 = vld [vmem:[%s1143_s2 + $0x6] ss:$0 sm:$0xff] }
   0xc   :  { %858 = vmatmul.mubr.msk.f32.vlgmr.msra.gmra.mrb[2].mxu1 %vm25_vm4, %v15_v11  ;;  %907 = vmatpush3.bf16.msk.msra.mxu0 %vm1016_vm2, %v905_v20  ;;  %v805_v62 = vld [vmem:[%s1143_s2 + $0x7] ss:$0 sm:$0xff]  ;;  %s987_s2 = smov [#allocation2]  }
   0xd   :  { %911 = vmatpush3.bf16.msk.msra.mxu1 %vm1016_vm2, %v909_v21  ;;  %864 = vmatprep.mubr.msk.f32.mxu0 %vm985_vm3, %v986_v8  ;;  %s752_s5 = sshll.u32 %s987_s2, 4  ;;  %s753_s5 = int_to_ptr.vmem [resolvable:$true] %s752_s5 }
   0xe   :  { %871 = vmatprep.mubr.msk.f32.mxu1 %vm985_vm3, %v986_v8  ;;  %912 = vmatprep.subr.bf16.mxu0 %v983_v2  ;;  %s959_s6 = scalar_lea.vmem %s753_s5, 256  ;;  %p964_p1 = scmp.lt.s32.totalorder %s753_s5, %s753_s5 }
   0xf   :  { %865 = vmatmul.mubr.msk.f32.vlgmr.msra.gmra.mrb[4].mxu0 %vm25_vm4, %v15_v11  ;;  %916 = vmatprep.subr.bf16.mxu1 %v983_v2  ;;  %p960_p0 = scmp.ne.s32.totalorder %s753_s5, %s959_s6  ;;  %p965_p2 = scmp.lt.s32.totalorder %s959_s6, %s959_s6 }
  0x10   :  { %872 = vmatmul.mubr.msk.f32.vlgmr.msra.gmra.mrb[4].mxu1 %vm25_vm4, %v15_v11  ;;  %915 = vmatpush3.bf16.msk.msra.mxu0 %vm1016_vm2, %v913_v26 }
  0x11   :  { %919 = vmatpush3.bf16.msk.msra.mxu1 %vm1016_vm2, %v917_v27  ;;  %878 = vmatprep.mubr.msk.f32.mxu0 %vm985_vm3, %v986_v8  ;;  %p966_p3 = por %p965_p2, %p964_p1 }
  0x12   :  { %885 = vmatprep.mubr.msk.f32.mxu1 %vm985_vm3, %v986_v8 }
  0x13   :  { %879 = vmatmul.mubr.msk.f32.vlgmr.msra.gmra.mrb[6].mxu0 %vm25_vm4, %v15_v11  ;;  %p967_p4 = pnand %p966_p3, %p960_p0 }
  0x14   :  { %886 = vmatmul.mubr.msk.f32.vlgmr.msra.gmra.mrb[6].mxu1 %vm25_vm4, %v15_v11 }
  0xda   :  { %v99_v30 = vpop.f32.mrb[0].mxu0 }
  0xdb   :  { %v100_v31 = vadd.f32 %v763_v28, %v99_v30  ;;  %v190_v32 = vpop.f32.mrb[0].mxu1  ;;  %v838_v33 = vpop.f32.mrb[1].mxu0 }
  0xdc   :  { %v191_v34 = vadd.f32 %v769_v29, %v190_v32  ;;  %v845_v35 = vpop.f32.mrb[1].mxu1 }
  0xdd   :  { %v103_v37 = vsub.f32 0.0, %v100_v31 }
  0xde   :  { %v194_v39 = vsub.f32 0.0, %v191_v34  ;;  %v281_v40 = vpop.f32.mrb[2].mxu0 }
  0xdf   :  { %v104_v41 = vmul.f32 1.442695, %v103_v37  ;;  %v282_v42 = vadd.f32 %v775_v36, %v281_v40  ;;  %v372_v43 = vpop.f32.mrb[2].mxu1  ;;  %v852_v44 = vpop.f32.mrb[3].mxu0 }
  0xe0   :  { %v195_v45 = vmul.f32 1.442695, %v194_v39  ;;  %v373_v46 = vadd.f32 %v781_v38, %v372_v43  ;;  %v859_v47 = vpop.f32.mrb[3].mxu1 }
  0xe1   :  { %927 = vpow2.f32 %v104_v41  ;;  %v285_v49 = vsub.f32 0.0, %v282_v42 }
  0xe2   :  { %929 = vpow2.f32 %v195_v45  ;;  %v376_v51 = vsub.f32 0.0, %v373_v46  ;;  %v463_v52 = vpop.f32.mrb[4].mxu0 }
  0xe3   :  { %v286_v53 = vmul.f32 1.442695, %v285_v49  ;;  %v464_v54 = vadd.f32 %v787_v48, %v463_v52  ;;  %v554_v55 = vpop.f32.mrb[4].mxu1  ;;  %v866_v56 = vpop.f32.mrb[5].mxu0 }
  0xe4   :  { %v377_v57 = vmul.f32 1.442695, %v376_v51  ;;  %v555_v58 = vadd.f32 %v793_v50, %v554_v55  ;;  %v873_v59 = vpop.f32.mrb[5].mxu1 }
  0xe5   :  { %931 = vpow2.f32 %v286_v53  ;;  %v467_v61 = vsub.f32 0.0, %v464_v54 }
  0xe6   :  { %933 = vpow2.f32 %v377_v57  ;;  %v558_v63 = vsub.f32 0.0, %v555_v58  ;;  %v645_v0 = vpop.f32.mrb[6].mxu0 }
  0xe7   :  { %v468_v1 = vmul.f32 1.442695, %v467_v61  ;;  %v646_v2 = vadd.f32 %v799_v60, %v645_v0  ;;  %v736_v3 = vpop.f32.mrb[6].mxu1  ;;  %v880_v4 = vpop.f32.mrb[7].mxu0 }
  0xe8   :  { %v559_v5 = vmul.f32 1.442695, %v558_v63  ;;  %v737_v6 = vadd.f32 %v805_v62, %v736_v3  ;;  %v887_v7 = vpop.f32.mrb[7].mxu1 }
  0xe9   :  { %935 = vpow2.f32 %v468_v1  ;;  %v649_v8 = vsub.f32 0.0, %v646_v2 }
  0xea   :  { %937 = vpow2.f32 %v559_v5  ;;  %v740_v9 = vsub.f32 0.0, %v737_v6 }
  0xeb   :  { %v928_v10 = vpop.eup %927  ;;  %v650_v11 = vmul.f32 1.442695, %v649_v8 }
  0xec   :  { %v930_v12 = vpop.eup %929  ;;  %v106_v13 = vadd.f32 1.0, %v928_v10  ;;  %v741_v14 = vmul.f32 1.442695, %v740_v9 }
  0xed   :  { %v197_v15 = vadd.f32 1.0, %v930_v12  ;;  %939 = vpow2.f32 %v650_v11 }
  0xee   :  { %941 = vrcp.f32 %v106_v13 }
  0xef   :  { %v932_v16 = vpop.eup %931  ;;  %943 = vrcp.f32 %v197_v15 }
  0xf0   :  { %v934_v17 = vpop.eup %933  ;;  %v288_v18 = vadd.f32 1.0, %v932_v16  ;;  %945 = vpow2.f32 %v741_v14 }
  0xf1   :  { %v379_v19 = vadd.f32 1.0, %v934_v17 }
  0xf2   :  { %947 = vrcp.f32 %v288_v18 }
  0xf3   :  { %v936_v20 = vpop.eup %935  ;;  %949 = vrcp.f32 %v379_v19 }
  0xf4   :  { %v938_v21 = vpop.eup %937  ;;  %v470_v22 = vadd.f32 1.0, %v936_v20 }
  0xf5   :  { %v561_v23 = vadd.f32 1.0, %v938_v21 }
  0xf6   :  { %951 = vrcp.f32 %v470_v22 }
  0xf7   :  { %v940_v24 = vpop.eup %939  ;;  %953 = vrcp.f32 %v561_v23 }
  0xf8   :  { %v942_v25 = vpop.eup %941  ;;  %v652_v26 = vadd.f32 1.0, %v940_v24 }
  0xf9   :  { %v944_v27 = vpop.eup %943  ;;  %109 = vst.msk [vmem:[#allocation2] sm:$0x3] %vm108_vm5, %v942_v25 }
  0xfa   :  { %v946_v28 = vpop.eup %945  ;;  %200 = vst.msk [vmem:[#allocation2 + $0x2] sm:$0x3] %vm108_vm5, %v944_v27  ;;  %955 = vrcp.f32 %v652_v26 }
  0xfb   :  { %v743_v29 = vadd.f32 1.0, %v946_v28 }
  0xfc   :  { %v948_v30 = vpop.eup %947 }
  0xfd   :  { %v950_v31 = vpop.eup %949  ;;  %291 = vst.msk [vmem:[#allocation2 + $0x4] sm:$0x3] %vm108_vm5, %v948_v30  ;;  %957 = vrcp.f32 %v743_v29 }
  0xfe   :  { %382 = vst.msk [vmem:[#allocation2 + $0x6] sm:$0x3] %vm108_vm5, %v950_v31 }
 0x100   :  { %v952_v32 = vpop.eup %951 }
 0x101   :  { %v954_v33 = vpop.eup %953  ;;  %473 = vst.msk [vmem:[#allocation2 + $0x8] sm:$0x3] %vm108_vm5, %v952_v32 }
 0x102   :  { %564 = vst.msk [vmem:[#allocation2 + $0xa] sm:$0x3] %vm108_vm5, %v954_v33 }
 0x104   :  { %v956_v34 = vpop.eup %955 }
 0x105   :  { %655 = vst.msk [vmem:[#allocation2 + $0xc] sm:$0x3] %vm108_vm5, %v956_v34 }
 0x107   :  { %v958_v35 = vpop.eup %957 }
 0x108   :  { %746 = vst.msk [vmem:[#allocation2 + $0xe] sm:$0x3] %vm108_vm5, %v958_v35 }
 0x109   :  { %970 = shalt.err (!%p967_p4)
}
 0x10a   :  { %s971_s9 = scalar_lea.hbm %s1144_s3, 256 }
 0x10b   :  { %p972_p5 = scmp.ne.s32.totalorder %s1144_s3, %s971_s9  ;;  %p975_p6 = scmp.lt.u32.totalorder %s971_s9, %s1144_s3 }
 0x10d   :  { %p977_p7 = pnand %p975_p6, %p972_p5 }
 0x10f   :  { %980 = shalt.err (!%p977_p7)
}
 0x110   :  { %s988_s14 = smov 32   ;;  %s989_s15 = smov 2  }
 0x111   :  { %758 = dma.vmem_to_hbm [thread:$0]  %s753_s5, 256, %s1144_s3, [#allocation3], %s988_s14, %s988_s14, %s989_s15  }
 0x112   :  { %981 = dma.done.wait [#allocation3], 256  }
 0x113   :  { %982 = vsyncadd [#allocation3], 4294967040 }
 0x114   :  { %762 = vsyncpa [#allocation3], 1 }

</bundles_post_ra>
